<compile_context>
chip_gen: v7x
topology: tpu7x:2x2x1
jax: 0.10.0
libtpu: 0.0.40
codegen_flags: <defaults>
</compile_context>

<pallas_src>
import functools

import jax
import jax.numpy as jnp
from jax.experimental import pallas as pl
from jax.experimental.pallas import tpu as pltpu


def _round_up(x, m):
    return ((x + m - 1) // m) * m


def _sublane_multiple(dtype):
    itemsize = jnp.dtype(dtype).itemsize
    if itemsize >= 4:
        return 8
    if itemsize == 2:
        return 16
    return 32


def _feature_resizer_kernel(x_ref, wt_ref, pgbm_ref, o_ref, *, eps, c2_valid):
    # x_ref:    (TM, C1)   row tile of flattened tokens (native dtype)
    # wt_ref:   (C1, C2P)  transposed, column-padded Linear weight (native dtype)
    # pgbm_ref: (4,  C2P)  [bias; gamma; beta; valid-col mask], f32, col-padded
    # o_ref:    (TM, C2P)  output tile (lane-dense: C2P % 128 == 0)

    # Linear: x @ W^T  (MXU matmul, native operands, f32 accumulation).
    y = jnp.dot(x_ref[...], wt_ref[...], preferred_element_type=jnp.float32)

    pgbm = pgbm_ref[...]                 # (4, C2P) f32
    bias = pgbm[0:1, :]
    gamma = pgbm[1:2, :]
    beta = pgbm[2:3, :]

    y = y + bias                         # f32

    c2p = y.shape[-1]
    if c2_valid == c2p:
        # No feature padding: plain LayerNorm over the last axis.
        mean = jnp.mean(y, axis=-1, keepdims=True)
        centered = y - mean
        var = jnp.mean(centered * centered, axis=-1, keepdims=True)
    else:
        # Padded columns of y are exactly 0 (W / bias pads are zero), so the
        # mean needs no mask; only the centering does (keeps the numerically
        # safe centered form for the variance).
        inv_n = jnp.float32(1.0 / c2_valid)
        mean = jnp.sum(y, axis=-1, keepdims=True) * inv_n
        centered = (y - mean) * pgbm[3:4, :]
        var = jnp.sum(centered * centered, axis=-1, keepdims=True) * inv_n

    y_hat = centered * jax.lax.rsqrt(var + eps)
    out = y_hat * gamma + beta           # padded cols: gamma=beta=0 -> 0

    # Dropout in eval mode == identity.
    o_ref[...] = out.astype(o_ref.dtype)


def feature_resizer(x, weight, bias, ln_gamma, ln_beta, *, eps=1e-12,
                    tile_rows=1024, cast_operands_to_bf16=False):
    """x: (..., C1); weight: (C2, C1); bias/ln_gamma/ln_beta: (C2,)."""
    orig_shape = x.shape
    c1 = orig_shape[-1]
    c2 = weight.shape[0]
    n = 1
    for d in orig_shape[:-1]:
        n *= d
    x2d = x.reshape(n, c1)
    out_dtype = x.dtype

    # Optional inference fast-path: bf16 MXU operands, f32 LN math unchanged.
    if cast_operands_to_bf16 and x2d.dtype == jnp.float32:
        x2d = x2d.astype(jnp.bfloat16)
        weight = weight.astype(jnp.bfloat16)

    # Lane-dense output: pad C2 up to a multiple of 128 (zeros in W / b / gamma
    # / beta; LayerNorm variance is masked to the valid channels).
    c2p = _round_up(c2, 128)
    wt = weight.T                                      # (C1, C2), native dtype
    if c2p != c2:
        wt = jnp.pad(wt, ((0, 0), (0, c2p - c2)))

    def _pad_vec(v):
        v = v.astype(jnp.float32)
        if c2p != c2:
            v = jnp.pad(v, (0, c2p - c2))
        return v

    mask = jnp.ones((c2,), jnp.float32)
    if c2p != c2:
        mask = jnp.pad(mask, (0, c2p - c2))
    # Pack bias / gamma / beta / mask into one (4, C2P) block -> one invariant DMA.
    pgbm = jnp.stack([_pad_vec(bias), _pad_vec(ln_gamma), _pad_vec(ln_beta),
                      mask], axis=0)

    x_bytes = jnp.dtype(x2d.dtype).itemsize
    w_bytes = jnp.dtype(wt.dtype).itemsize
    o_bytes = jnp.dtype(out_dtype).itemsize
    sub = _sublane_multiple(x2d.dtype)

    # VMEM budget from the actual chip (v5e/v6e 128 MiB, v7x 64 MiB), with headroom.
    try:
        info = pltpu.get_tpu_info()
        vmem_cap = int(getattr(info, "vmem_capacity_bytes", 64 << 20))
    except Exception:
        vmem_cap = 64 << 20
    vmem_budget = int(vmem_cap * 3 // 4)

    def _vmem_need(tm):
        # Double-buffered x / out tiles, single-buffered invariant W^T / pgbm,
        # plus ~3 live (tm, c2p) f32 intermediates (y, centered, y_hat) + slack.
        return (2 * tm * c1 * x_bytes
                + 2 * tm * c2p * o_bytes
                + c1 * c2p * w_bytes
                + 4 * c2p * 4
                + 3 * tm * c2p * 4
                + (2 << 20))

    # Row tiling: big tiles for MXU / pipeline efficiency, rounded to the
    # dtype's packed-sublane multiple, shrunk to fit VMEM.
    tm = max(sub, min(int(tile_rows), _round_up(n, sub)))
    tm = _round_up(tm, sub)
    while tm > sub and _vmem_need(tm) > vmem_budget:
        tm = _round_up(max(sub, tm // 2), sub)
    # Ensure >= 2 grid steps so a 2-TensorCore chip (v7x) can shard the
    # "parallel" axis; no-op on v5e/v6e and for tiny N.
    while pl.cdiv(n, tm) < 2 and tm > sub:
        tm = _round_up(max(sub, tm // 2), sub)

    grid = (pl.cdiv(n, tm),)
    vmem_limit = int(min(max(_vmem_need(tm), 16 << 20), vmem_cap))

    kernel = functools.partial(_feature_resizer_kernel, eps=eps, c2_valid=c2)

    out2d = pl.pallas_call(
        kernel,
        out_shape=jax.ShapeDtypeStruct((n, c2p), out_dtype),
        grid_spec=pltpu.PrefetchScalarGridSpec(
            num_scalar_prefetch=0,
            grid=grid,
            in_specs=[
                pl.BlockSpec((tm, c1), lambda i: (i, 0)),        # x row tile
                pl.BlockSpec((c1, c2p), lambda i: (0, 0),        # W^T (resident)
                             pipeline_mode=pl.Buffered(1)),
                pl.BlockSpec((4, c2p), lambda i: (0, 0),         # bias/gamma/beta/mask
                             pipeline_mode=pl.Buffered(1)),
            ],
            out_specs=pl.BlockSpec((tm, c2p), lambda i: (i, 0)),
        ),
        compiler_params=pltpu.CompilerParams(
            dimension_semantics=("parallel",),
            vmem_limit_bytes=vmem_limit,
        ),
    )(x2d, wt, pgbm)

    if c2p != c2:
        out2d = out2d[:, :c2]
    return out2d.reshape(*orig_shape[:-1], c2)


def reference_feature_resizer(x, weight, bias, ln_gamma, ln_beta, eps=1e-12):
    y = jnp.einsum("...i,oi->...o", x.astype(jnp.float32),
                   weight.astype(jnp.float32)) + bias.astype(jnp.float32)
    mean = jnp.mean(y, axis=-1, keepdims=True)
    var = jnp.mean(jnp.square(y - mean), axis=-1, keepdims=True)
    out = (y - mean) / jnp.sqrt(var + eps) * ln_gamma.astype(jnp.float32) \
        + ln_beta.astype(jnp.float32)
    return out


def _make_params(key, c1, c2, dtype):
    kw, kb, kg, kbt = jax.random.split(key, 4)
    weight = (jax.random.normal(kw, (c2, c1), dtype=jnp.float32)
              * (1.0 / jnp.sqrt(c1))).astype(dtype)
    bias = (jax.random.normal(kb, (c2,), dtype=jnp.float32) * 0.01).astype(dtype)
    ln_gamma = (1.0 + 0.1 * jax.random.normal(kg, (c2,), dtype=jnp.float32))
    ln_beta = (0.1 * jax.random.normal(kbt, (c2,), dtype=jnp.float32))
    return weight, bias, ln_gamma, ln_beta


if __name__ == "__main__":
    key = jax.random.PRNGKey(0)
    k1, k2, k3, kp1, kp2, kp3 = jax.random.split(key, 6)

    # Case 1: lane-aligned shapes (C2 multiple of 128), f32.
    B, S, C1, C2 = 2, 8, 128, 256
    x = jax.random.normal(k1, (B, S, C1), dtype=jnp.float32)
    w, b, g, be = _make_params(kp1, C1, C2, jnp.float32)
    out = jax.block_until_ready(feature_resizer(x, w, b, g, be))
    ref = reference_feature_resizer(x, w, b, g, be)
    assert out.shape == (B, S, C2), out.shape
    assert jnp.allclose(out, ref, atol=1e-4, rtol=1e-4), \
        float(jnp.max(jnp.abs(out - ref)))

    # Case 2: unaligned shapes (odd row count, C2 not a multiple of 128) ->
    # exercises the ragged last row tile + masked LayerNorm over padded columns.
    B2, S2, C1u, C2u = 2, 7, 32, 64
    x2 = jax.random.normal(k2, (B2, S2, C1u), dtype=jnp.float32)
    w2, b2, g2, be2 = _make_params(kp2, C1u, C2u, jnp.float32)
    out2 = jax.block_until_ready(feature_resizer(x2, w2, b2, g2, be2))
    ref2 = reference_feature_resizer(x2, w2, b2, g2, be2)
    assert out2.shape == (B2, S2, C2u), out2.shape
    assert jnp.allclose(out2, ref2, atol=1e-4, rtol=1e-4), \
        float(jnp.max(jnp.abs(out2 - ref2)))

    # Case 3: bf16 inputs/weights fed natively to the MXU (f32 accumulation).
    x3 = jax.random.normal(k3, (B, S, C1), dtype=jnp.bfloat16)
    w3, b3, g3, be3 = _make_params(kp3, C1, C2, jnp.bfloat16)
    out3 = jax.block_until_ready(feature_resizer(x3, w3, b3, g3, be3))
    ref3 = reference_feature_resizer(x3, w3, b3, g3, be3)
    assert out3.shape == (B, S, C2), out3.shape
    assert jnp.allclose(out3.astype(jnp.float32), ref3, atol=5e-2, rtol=5e-2), \
        float(jnp.max(jnp.abs(out3.astype(jnp.float32) - ref3)))

    # Case 4: opt-in bf16 MXU operands for f32 inputs (inference fast path).
    out4 = jax.block_until_ready(
        feature_resizer(x, w, b, g, be, cast_operands_to_bf16=True))
    assert out4.shape == (B, S, C2), out4.shape
    assert jnp.allclose(out4, ref, atol=5e-2, rtol=5e-2), \
        float(jnp.max(jnp.abs(out4 - ref)))

    print("KERNEL_OK")
</pallas_src>

<mosaic_0001>
module attributes {stable_mosaic.version = 11 : i64} {
  func.func @_feature_resizer_kernel(%arg0: i32, %arg1: memref<8x128xf32, #tpu.memory_space<vmem>>, %arg2: memref<128x256xf32, #tpu.memory_space<vmem>>, %arg3: memref<4x256xf32, #tpu.memory_space<vmem>>, %arg4: memref<8x256xf32, #tpu.memory_space<vmem>>) attributes {dimension_semantics = [#tpu.dimension_semantics<parallel>], iteration_bounds = array<i64: 2>, scalar_prefetch = 0 : i64, scratch_operands = 0 : i64, tpu.core_type = #tpu.core_type<tc>, window_params = [{transform_indices = @transform_0, window_bounds = array<i64: 8, 128>}, {pipeline_mode = #tpu.pipeline_mode<synchronous>, transform_indices = @transform_1, window_bounds = array<i64: 128, 256>}, {pipeline_mode = #tpu.pipeline_mode<synchronous>, transform_indices = @transform_2, window_bounds = array<i64: 4, 256>}, {transform_indices = @transform_3, window_bounds = array<i64: 8, 256>}]} {
    %c0 = arith.constant 0 : index
    %c0_0 = arith.constant 0 : index
    %0 = vector.load %arg1[%c0, %c0_0] : memref<8x128xf32, #tpu.memory_space<vmem>>, vector<8x128xf32>
    %c0_1 = arith.constant 0 : index
    %c0_2 = arith.constant 0 : index
    %1 = vector.load %arg2[%c0_1, %c0_2] : memref<128x256xf32, #tpu.memory_space<vmem>>, vector<128x256xf32>
    %cst = arith.constant dense<0.000000e+00> : vector<8x256xf32>
    %2 = tpu.matmul %0, %1, %cst {dimension_numbers = #tpu.dot_dimension_numbers<[1], [0], [0], [1], [0, 0, 1, 1], [], []>} : vector<8x128xf32>, vector<128x256xf32>, vector<8x256xf32> -> vector<8x256xf32>
    %c0_3 = arith.constant 0 : index
    %c0_4 = arith.constant 0 : index
    %3 = vector.load %arg3[%c0_3, %c0_4] : memref<4x256xf32, #tpu.memory_space<vmem>>, vector<4x256xf32>
    %4 = vector.extract_strided_slice %3 {offsets = [0, 0], sizes = [1, 256], strides = [1, 1]} : vector<4x256xf32> to vector<1x256xf32>
    %5 = vector.extract_strided_slice %3 {offsets = [1, 0], sizes = [1, 256], strides = [1, 1]} : vector<4x256xf32> to vector<1x256xf32>
    %6 = vector.extract_strided_slice %3 {offsets = [2, 0], sizes = [1, 256], strides = [1, 1]} : vector<4x256xf32> to vector<1x256xf32>
    %7 = vector.broadcast %4 : vector<1x256xf32> to vector<8x256xf32>
    %8 = arith.addf %2, %7 : vector<8x256xf32>
    %cst_5 = arith.constant dense<0.000000e+00> : vector<8xf32>
    %9 = vector.multi_reduction <add>, %8, %cst_5 [1] : vector<8x256xf32> to vector<8xf32>
    %10 = vector.shape_cast %9 : vector<8xf32> to vector<8x1xf32>
    %cst_6 = arith.constant 2.560000e+02 : f32
    %11 = vector.broadcast %cst_6 : f32 to vector<8x1xf32>
    %12 = arith.divf %10, %11 : vector<8x1xf32>
    %13 = vector.broadcast %12 : vector<8x1xf32> to vector<8x256xf32>
    %14 = arith.subf %8, %13 : vector<8x256xf32>
    %15 = arith.mulf %14, %14 : vector<8x256xf32>
    %cst_7 = arith.constant dense<0.000000e+00> : vector<8xf32>
    %16 = vector.multi_reduction <add>, %15, %cst_7 [1] : vector<8x256xf32> to vector<8xf32>
    %17 = vector.shape_cast %16 : vector<8xf32> to vector<8x1xf32>
    %cst_8 = arith.constant 2.560000e+02 : f32
    %18 = vector.broadcast %cst_8 : f32 to vector<8x1xf32>
    %19 = arith.divf %17, %18 : vector<8x1xf32>
    %cst_9 = arith.constant 9.99999996E-13 : f32
    %20 = vector.broadcast %cst_9 : f32 to vector<8x1xf32>
    %21 = arith.addf %19, %20 : vector<8x1xf32>
    %22 = math.rsqrt %21 : vector<8x1xf32>
    %23 = vector.broadcast %22 : vector<8x1xf32> to vector<8x256xf32>
    %24 = arith.mulf %14, %23 : vector<8x256xf32>
    %25 = vector.broadcast %5 : vector<1x256xf32> to vector<8x256xf32>
    %26 = arith.mulf %24, %25 : vector<8x256xf32>
    %27 = vector.broadcast %6 : vector<1x256xf32> to vector<8x256xf32>
    %28 = arith.addf %26, %27 : vector<8x256xf32>
    %c0_10 = arith.constant 0 : index
    %c0_11 = arith.constant 0 : index
    %29 = vector.load %arg4[%c0_10, %c0_11] : memref<8x256xf32, #tpu.memory_space<vmem>>, vector<8x256xf32>
    tpu.vector_store %arg4[%c0_10, %c0_11], %28 {strides = array<i32>} : memref<8x256xf32, #tpu.memory_space<vmem>>, vector<8x256xf32>,
    return
  }
  func.func @transform_0(%arg0: i32) -> (i32, i32) {
    %c0_i32 = arith.constant 0 : i32
    %c0_i32_0 = arith.constant 0 : i32
    return %arg0, %c0_i32 : i32, i32
  }
  func.func @transform_1(%arg0: i32) -> (i32, i32) {
    %c0_i32 = arith.constant 0 : i32
    %c0_i32_0 = arith.constant 0 : i32
    %c0_i32_1 = arith.constant 0 : i32
    return %c0_i32, %c0_i32_0 : i32, i32
  }
  func.func @transform_2(%arg0: i32) -> (i32, i32) {
    %c0_i32 = arith.constant 0 : i32
    %c0_i32_0 = arith.constant 0 : i32
    %c0_i32_1 = arith.constant 0 : i32
    return %c0_i32, %c0_i32_0 : i32, i32
  }
  func.func @transform_3(%arg0: i32) -> (i32, i32) {
    %c0_i32 = arith.constant 0 : i32
    %c0_i32_0 = arith.constant 0 : i32
    return %arg0, %c0_i32 : i32, i32
  }
}

</mosaic_0001>

<bundles_post_ra>
// kernel: tpu_custom_call.1
= control target key start
LH: loop header
LB: loop body
LE: loop exit
PB: predicated region body
PF: predicated region fallthrough
CT: control target
= control target key end

     0   :  { %8 = vsyncpa [#allocation3], 0  ;;  %s1040_s0 = inlined_call_operand.hbm [shape: f32[16,128], index: 0, kind: input, shape index: {}]   ;;  %s1041_s1 = inlined_call_operand.hbm [shape: f32[128,256], index: 1, kind: input, shape index: {}]   ;;  %s1042_s2 = inlined_call_operand.hbm [shape: f32[4,256], index: 2, kind: input, shape index: {}]   ;;  %s1043_s3 = inlined_call_operand.hbm [shape: f32[16,256], index: 3, kind: output, shape index: {}]  }
   0x1   :  { %10 = vsyncpa [#allocation3 + $0x1], 0 }
   0x2   :  { %11 = vsyncpa [#allocation6], 0 }
   0x3   :  { %12 = vsyncpa [#allocation4], 0 }
   0x4   :  { %14 = vsyncpa [#allocation4 + $0x1], 0  ;;  %s807_s12 = smov 0   ;;  %s809_s13 = smov 0  }
   0x5   :  { %s811_s14 = smov 0   ;;  %s813_s15 = smov 0  }
   0x6 LB: > { %s828_s16 = sadd.s32 4294967295, %s778_s15   ;;  %s500_s17 = sadd.s32 4294967294, %s778_s15   ;;  %s778_s15 = sphi %s813_s15, %s1063_s15   ;;  %s774_s14 = sphi %s811_s14, %s1062_s14   ;;  %s770_s13 = sphi %s809_s13, %s1061_s13   ;;  %s766_s12 = sphi %s807_s12, %s1060_s12  }
   0x7   : > { %p40_p0 = scmp.ne.s32.totalorder %s770_s13, %s766_s12  ;;  %p1044_p1 = scmp.eq.s32.totalorder %s828_s16, 0 }
   0x8   : > { %p112_p3 = scmp.eq.s32.totalorder %s500_s17, 1  ;;  %p501_p5 = scmp.ge.s32.totalorder %s778_s15, 1 }
   0x9   : > { %p837_p4 = por %p1044_p1, %p40_p0  ;;  %p119_p7 = scmp.lt.s32.totalorder %s778_s15, 3 }
   0xa   : > { %p842_p6 = por %p112_p3, %p40_p0  ;;  %s780_s21 = smov [#allocation5]  }
   0xb   : > { %s1047_s18 = scalar_select %p837_p4, 1, 0 }
   0xc   : > { %s1048_s19 = scalar_select %p842_p6, 1, 0 }
   0xd   : > { %p847_p8 = pnand %p501_p5, %p119_p7  ;;  %s131_s22 = sshll.u32 %s780_s21, 4  ;;  %s851_s22 = int_to_ptr.vmem [resolvable:$true] %s131_s22 }
   0xe   : > { %s781_s24 = smov [#allocation7]   ;;  %s622_s28 = scalar_lea.hbm %s1041_s1, 4096 }
   0xf   : > { %p562_p9 = pneg %p847_p8  ;;  %s145_s25 = sshll.u32 %s781_s24, 4  ;;  %s862_s25 = int_to_ptr.vmem [resolvable:$true] %s145_s25 }
  0x10   : > { %p623_p12 = scmp.ne.s32.totalorder %s1041_s1, %s622_s28  ;;  %p629_p5 = scmp.lt.u32.totalorder %s622_s28, %s1041_s1 }
  0x11   : > { %p858_p11 = pnand %p562_p9, %p1044_p1 }
  0x13   : > { %p624_p13 = pneg %p858_p11 }
  0x15   : > { %p625_p0 = pnand %p624_p13, %p623_p12 }
  0x17   : > { %p626_p3 = pneg %p625_p0 }
  0x19   : > { %p631_p7 = pnand %p629_p5, %p626_p3 }
  0x1b   : > { %634 = shalt.err (!%p631_p7)
}
  0x1c   : > { %s635_s6 = scalar_lea.vmem %s851_s22, 4096  ;;  %p643_p2 = scmp.lt.s32.totalorder %s851_s22, %s851_s22 }
  0x1d   : > { %p636_p9 = scmp.ne.s32.totalorder %s851_s22, %s635_s6  ;;  %p644_p12 = scmp.lt.s32.totalorder %s635_s6, %s635_s6 }
  0x1f   : > { %p638_p10 = pnand %p636_p9, %p624_p13  ;;  %p645_p0 = por %p644_p12, %p643_p2 }
  0x21   : > { %p639_p1 = pneg %p638_p10 }
  0x23   : > { %p646_p6 = pnand %p645_p0, %p639_p1 }
  0x25   : > { %649 = shalt.err (!%p646_p6)
}
  0x26   : > { %s782_s7 = smov 256   ;;  %s783_s8 = smov 16  }
  0x27   : > { %565 = dma.hbm_to_vmem [thread:$0]  (!%p858_p11), %s1041_s1, 4096, %s851_s22, [#allocation6], %s782_s7, %s782_s7, %s783_s8  }
  0x28   : > { %s650_s21 = scalar_lea.hbm %s1042_s2, 128 }
  0x29   : > { %p651_p2 = scmp.ne.s32.totalorder %s1042_s2, %s650_s21  ;;  %p657_p10 = scmp.lt.u32.totalorder %s650_s21, %s1042_s2 }
  0x2b   : > { %p653_p1 = pnand %p651_p2, %p624_p13 }
  0x2d   : > { %p654_p6 = pneg %p653_p1 }
  0x2f   : > { %p659_p3 = pnand %p657_p10, %p654_p6 }
  0x31   : > { %662 = shalt.err (!%p659_p3)
}
  0x32   : > { %s663_s22 = scalar_lea.vmem %s862_s25, 128  ;;  %p671_p12 = scmp.lt.s32.totalorder %s862_s25, %s862_s25 }
  0x33   : > { %p664_p5 = scmp.ne.s32.totalorder %s862_s25, %s663_s22  ;;  %p672_p0 = scmp.lt.s32.totalorder %s663_s22, %s663_s22 }
  0x35   : > { %p666_p7 = pnand %p664_p5, %p624_p13  ;;  %p673_p2 = por %p672_p0, %p671_p12 }
  0x37   : > { %p667_p9 = pneg %p666_p7 }
  0x39   : > { %p674_p1 = pnand %p673_p2, %p667_p9 }
  0x3b   : > { %677 = shalt.err (!%p674_p1)
}
  0x3c   : > { %568 = dma.hbm_to_vmem [thread:$0]  (!%p858_p11), %s1042_s2, 128, %s862_s25, [#allocation6]  }
  0x3d   : > { %s917_s4 = sadd.s32 1, %s778_s15   ;;  %s27_s23 = sadd.s32 1, %s774_s14 }
  0x3e   : > { %s24_s5 = ssub.s32 %s778_s15, %s917_s4  ;;  %p34_p13 = scmp.ne.s32.totalorder %s774_s14, %s770_s13 }
  0x3f   : > { %p25_p6 = scmp.eq.s32.totalorder %s24_s5, 0  ;;  %p35_p10 = scmp.eq.s32.totalorder %s778_s15, 0 }
  0x40   : > { %p1051_p3 = scmp.eq.s32.totalorder %s828_s16, 1  ;;  %p579_p7 = scmp.lt.s32.totalorder %s778_s15, 2 }
  0x41   : > { %s933_s7 = scalar_select %p25_p6, %s774_s14, %s27_s23  }
  0x42   : > { %p927_p5 = por %p1051_p3, %p34_p13  ;;  %p36_p9 = por %p35_p10, %p34_p13 }
  0x43   : > { %s156_s8 = sand.u32 1, %s774_s14   ;;  %s506_s25 = sshll.u32 %s778_s15, 7 }
  0x44   : > { %s1052_s6 = scalar_select %p927_p5, 1, 0 }
  0x45   : > { %s505_s9 = sshll.u32 %s156_s8, 3  ;;  %s940_s17 = scalar_lea.hbm %s1040_s0, %s506_s25 }
  0x46   : > { %s160_s21 = scalar_lea.vmem [#allocation2], %s505_s9  ;;  %p944_p11 = pnand %p579_p7, %p36_p9 }
  0x47   : > { %s167_s24 = sshll.u32 %s160_s21, 4  ;;  %s157_s27 = scalar_lea.sflag [#allocation3], %s156_s8  ;;  %s942_s24 = int_to_ptr.vmem [resolvable:$true] %s167_s24 }
  0x48   : > { %s678_s28 = scalar_lea.hbm %s940_s17, 128  ;;  %p680_p0 = pneg %p944_p11 }
  0x49   : > { %p679_p12 = scmp.ne.s32.totalorder %s940_s17, %s678_s28  ;;  %s683_s30 = scalar_lea.hbm %s1040_s0, 256 }
  0x4a   : > { %p684_p13 = scmp.lt.u32.totalorder %s940_s17, %s1040_s0  ;;  %p685_p6 = scmp.lt.u32.totalorder %s683_s30, %s678_s28 }
  0x4b   : > { %p681_p2 = pnand %p680_p0, %p679_p12  ;;  %p687_p3 = scmp.lt.u32.totalorder %s678_s28, %s940_s17 }
  0x4c   : > { %p686_p10 = por %p685_p6, %p684_p13 }
  0x4d   : > { %p682_p1 = pneg %p681_p2 }
  0x4e   : > { %p688_p7 = por %p687_p3, %p686_p10 }
  0x50   : > { %p689_p9 = pnand %p688_p7, %p682_p1 }
  0x52   : > { %692 = shalt.err (!%p689_p9)
}
  0x53   : > { %s693_s8 = scalar_lea.vmem %s942_s24, 128  ;;  %s784_s9 = smov [#allocation2]  }
  0x54   : > { %p694_p12 = scmp.ne.s32.totalorder %s942_s24, %s693_s8  ;;  %s698_s25 = sshll.u32 %s784_s9, 4  ;;  %s699_s25 = int_to_ptr.vmem [resolvable:$false] %s698_s25 }
  0x55   : > { %s700_s10 = scalar_lea.vmem %s699_s25, 256  ;;  %p701_p4 = scmp.lt.s32.totalorder %s942_s24, %s699_s25 }
  0x56   : > { %p696_p2 = pnand %p694_p12, %p680_p0  ;;  %p702_p13 = scmp.lt.s32.totalorder %s700_s10, %s693_s8 }
  0x58   : > { %p697_p5 = pneg %p696_p2  ;;  %p703_p6 = por %p702_p13, %p701_p4 }
  0x5a   : > { %p704_p10 = pnand %p703_p6, %p697_p5 }
  0x5c   : > { %707 = shalt.err (!%p704_p10)
}
  0x5d   : > { %572 = dma.hbm_to_vmem [thread:$0]  (!%p944_p11), %s940_s17, 128, %s942_s24, %s157_s27  }
  0x5e   : > { %176 = sbr.rel (%p847_p8) target bundleno = 684 (0x2ac), region = 32  ;;  %s976_s11 = sand.u32 (!%p847_p8), 1, %s770_s13  }
  0x5f   : > { %s508_s21 = sshll.u32 (!%p847_p8), %s976_s11, 3  ;;  %s179_s28 = scalar_lea.sflag (!%p847_p8), [#allocation3], %s976_s11 }
  0x60   : > { %s980_s22 = scalar_lea.vmem (!%p847_p8), [#allocation2], %s508_s21  ;;  %p1054_p4 = scmp.ne.s32.totalorder (!%p847_p8), %s1047_s18, 0 }
  0x65   : > { %753 = dma.done.wait (%p1054_p4), %s179_s28, 128  }
  0x66   : > { %755 = vsyncadd (%p1054_p4), %s179_s28, 4294967168  ;;  %p1055_p5 = scmp.eq.s32.totalorder %s828_s16, 0 }
  0x68   : > { %757 = dma.done.wait (%p1055_p5), [#allocation6], 4224   ;;  %p1056_p8 = pmov %p1055_p5 }
  0x69   : > { %v785_v0 = vmov 0.0   ;;  %v215_v1 = vld [vmem:[#allocation5 + $0x8] sm:$0xff]  ;;  %v217_v2 = vld [vmem:[#allocation5 + $0x18] sm:$0xff]  ;;  %v214_v3 = vld [vmem:[#allocation5] sm:$0xff]  ;;  %v248_v50 = vlaneseq  ;;  %s511_s18 = sshll.u32 %s976_s11, 4  ;;  %s517_s20 = sshll.u32 %s828_s16, 8 }
  0x6a   : > { %759 = vsyncadd (%p1056_p8), [#allocation6], 4294963072  ;;  %330 = vmatprep.mubr.f32.mxu0 %v785_v0  ;;  %v518_v4 = vpack.c.bf16 %v217_v2, %v215_v1  ;;  %v216_v5 = vld [vmem:[#allocation5 + $0x10] sm:$0xff]  ;;  %v219_v6 = vld [vmem:[#allocation5 + $0x28] sm:$0xff]  ;;  %s212_s17 = scalar_lea.vmem [#allocation8], %s511_s18  ;;  %s996_s29 = scalar_lea.hbm %s1043_s3, %s517_s20 }
  0x6b   : > { %v221_v7 = vld [vmem:[#allocation5 + $0x38] sm:$0xff]  ;;  %v520_v8 = vpack.c.bf16 %v216_v5, %v214_v3  ;;  %v218_v10 = vld [vmem:[#allocation5 + $0x20] sm:$0xff]  ;;  %v220_v11 = vld [vmem:[#allocation5 + $0x30] sm:$0xff]  ;;  %v249_v51 = vshrl.u32 %v248_v50, 7  ;;  %s411_s24 = sshll.u32 %s212_s17, 4  ;;  %s397_s30 = scalar_lea.sflag [#allocation4], %s976_s11  ;;  %s998_s24 = int_to_ptr.vmem [resolvable:$true] %s411_s24 }
  0x6c   : > { %v522_v9 = vpack.c.bf16 %v221_v7, %v219_v6  ;;  %v223_v12 = vld [vmem:[#allocation5 + $0x48] sm:$0xff]  ;;  %519 = vmatprep.subr.bf16.mxu0 %v518_v4  ;;  %v225_v13 = vld [vmem:[#allocation5 + $0x58] sm:$0xff]  ;;  %v524_v14 = vpack.c.bf16 %v220_v11, %v218_v10  ;;  %v222_v16 = vld [vmem:[#allocation5 + $0x40] sm:$0xff]  ;;  %s708_s16 = scalar_lea.vmem %s998_s24, 256  ;;  %p1057_p0 = scmp.ne.s32.totalorder %s1052_s6, 0 }
  0x6d   : > { %521 = vmatpush1.bf16.msra.mxu0 %v520_v8  ;;  %v526_v15 = vpack.c.bf16 %v225_v13, %v223_v12  ;;  %v224_v17 = vld [vmem:[#allocation5 + $0x50] sm:$0xff]  ;;  %v227_v18 = vld [vmem:[#allocation5 + $0x68] sm:$0xff]  ;;  %v229_v19 = vld [vmem:[#allocation5 + $0x78] sm:$0xff]  ;;  %v250_v52 = vsub.s32 0, %v249_v51  ;;  %v254_v54 = vsub.s32 4, %v249_v51  ;;  %v356_v10 = vsub.s32 1, %v249_v51  ;;  %p709_p11 = scmp.ne.s32.totalorder %s998_s24, %s708_s16 }
  0x6e   : > { %523 = vmatprep.subr.bf16.mxu0 %v522_v9  ;;  %v528_v20 = vpack.c.bf16 %v224_v17, %v222_v16  ;;  %v530_v21 = vpack.c.bf16 %v229_v19, %v227_v18  ;;  %v226_v22 = vld [vmem:[#allocation5 + $0x60] sm:$0xff]  ;;  %v228_v23 = vld [vmem:[#allocation5 + $0x70] sm:$0xff]  ;;  %v231_v24 = vld [vmem:[#allocation5 + $0x88] sm:$0xff]  ;;  %v360_v11 = vsub.s32 5, %v249_v51  ;;  %v376_v12 = vsub.s32 2, %v249_v51  ;;  %s786_s23 = smov [#allocation8]  }
  0x6f   : > { %v233_v25 = vld [vmem:[#allocation5 + $0x98] sm:$0xff]  ;;  %v532_v26 = vpack.c.bf16 %v228_v23, %v226_v22  ;;  %v230_v28 = vld [vmem:[#allocation5 + $0x80] sm:$0xff]  ;;  %v232_v29 = vld [vmem:[#allocation5 + $0x90] sm:$0xff]  ;;  %v380_v13 = vsub.s32 6, %v249_v51  ;;  %p710_p1 = pnand %p709_p11, %p1057_p0  ;;  %s712_s5 = sshll.u32 %s786_s23, 4  ;;  %s713_s5 = int_to_ptr.vmem [resolvable:$false] %s712_s5 }
  0x70   : > { %v534_v27 = vpack.c.bf16 %v233_v25, %v231_v24  ;;  %v235_v30 = vld [vmem:[#allocation5 + $0xa8] sm:$0xff]  ;;  %v237_v31 = vld [vmem:[#allocation5 + $0xb8] sm:$0xff]  ;;  %v536_v32 = vpack.c.bf16 %v232_v29, %v230_v28  ;;  %v234_v34 = vld [vmem:[#allocation5 + $0xa0] sm:$0xff]  ;;  %s714_s8 = scalar_lea.vmem %s713_s5, 512  ;;  %p715_p7 = scmp.lt.s32.totalorder %s998_s24, %s713_s5 }
  0x71   : > { %525 = vmatpush1.bf16.msra.mxu0 %v524_v14  ;;  %v538_v33 = vpack.c.bf16 %v237_v31, %v235_v30  ;;  %v236_v35 = vld [vmem:[#allocation5 + $0xb0] sm:$0xff]  ;;  %v239_v36 = vld [vmem:[#allocation5 + $0xc8] sm:$0xff]  ;;  %v241_v37 = vld [vmem:[#allocation5 + $0xd8] sm:$0xff]  ;;  %p711_p3 = pneg %p710_p1  ;;  %p716_p9 = scmp.lt.s32.totalorder %s714_s8, %s708_s16 }
  0x72   : > { %527 = vmatprep.subr.bf16.mxu0 %v526_v15  ;;  %v540_v38 = vpack.c.bf16 %v236_v35, %v234_v34  ;;  %v542_v39 = vpack.c.bf16 %v241_v37, %v239_v36  ;;  %v238_v40 = vld [vmem:[#allocation5 + $0xc0] sm:$0xff]  ;;  %v240_v41 = vld [vmem:[#allocation5 + $0xd0] sm:$0xff]  ;;  %v243_v42 = vld [vmem:[#allocation5 + $0xe8] sm:$0xff] }
  0x73   : > { %v245_v43 = vld [vmem:[#allocation5 + $0xf8] sm:$0xff]  ;;  %v544_v44 = vpack.c.bf16 %v240_v41, %v238_v40  ;;  %v242_v46 = vld [vmem:[#allocation5 + $0xe0] sm:$0xff]  ;;  %v244_v47 = vld [vmem:[#allocation5 + $0xf0] sm:$0xff]  ;;  %p717_p12 = por %p716_p9, %p715_p7 }
  0x74   : > { %v546_v45 = vpack.c.bf16 %v245_v43, %v243_v42  ;;  %v548_v48 = vpack.c.bf16 %v244_v47, %v242_v46  ;;  %v213_v49 = vld [vmem:[%s980_s22] sm:$0xff]  ;;  %v246_v53 = vld [vmem:[#allocation7] sm:$0xff] }
  0x75   : > { %529 = vmatpush1.bf16.msra.mxu0 %v528_v20  ;;  %v251_v55 = vrot.slane %v246_v53, %v250_v52  ;;  %v255_v56 = vrot.slane %v246_v53, %v254_v54  ;;  %v357_v14 = vrot.slane %v246_v53, %v356_v10  ;;  %v361_v15 = vrot.slane %v246_v53, %v360_v11  ;;  %p718_p2 = pnand %p717_p12, %p711_p3 }
  0x76   : > { %531 = vmatprep.subr.bf16.mxu0 %v530_v21  ;;  %v377_v16 = vrot.slane %v246_v53, %v376_v12  ;;  %v381_v17 = vrot.slane %v246_v53, %v380_v13 }
  0x77   : > { %v261_v57 = vrot.slane %v251_v55, %v250_v52  ;;  %v265_v58 = vrot.slane %v255_v56, %v250_v52  ;;  %v367_v18 = vrot.slane %v357_v14, %v356_v10  ;;  %v371_v19 = vrot.slane %v361_v15, %v356_v10 }
  0x78   : > { %v387_v23 = vrot.slane %v377_v16, %v376_v12  ;;  %v391_v24 = vrot.slane %v381_v17, %v376_v12 }
  0x79   : > { %533 = vmatpush1.bf16.msra.mxu0 %v532_v26 }
  0x7a   : > { %535 = vmatprep.subr.bf16.mxu0 %v534_v27 }
  0x7d   : > { %537 = vmatpush1.bf16.msra.mxu0 %v536_v32 }
  0x7e   : > { %539 = vmatprep.subr.bf16.mxu0 %v538_v33 }
  0x81   : > { %541 = vmatpush1.bf16.msra.mxu0 %v540_v38 }
  0x82   : > { %543 = vmatprep.subr.bf16.mxu0 %v542_v39 }
  0x85   : > { %545 = vmatpush1.bf16.msra.mxu0 %v544_v44 }
  0x86   : > { %547 = vmatprep.subr.bf16.mxu0 %v546_v45 }
  0x89   : > { %549 = vmatpush1.bf16.msra.mxu0 %v548_v48 }
  0x8c   : > { %331 = vmatmul.mubr.f32.vlgmr.msra.gmra.mrb[0].mxu0 %v213_v49 }
 0x15f   : > { %v332_v59 = vpop.f32.mrb[0].mxu0 }
 0x160   : > { %v333_v60 = vadd.f32 %v332_v59, %v261_v57  ;;  %v334_v61 = vpop.f32.mrb[1].mxu0 }
 0x161   : > { %v335_v62 = vadd.f32 %v334_v61, %v265_v58 }
 0x163   : > { %v337_v63 = vadd.f32 %v335_v62, %v333_v60 }
 0x165   : > { %338 = vadd.xlane.f32.xlu0 %v337_v63 }
 0x1f2   : > { %v339_v0 = vpop.xlane.xlu0 %338 }
 0x1f3   : > { %v341_v1 = vmul.f32 0.00390625, %v339_v0 }
 0x1f5   : > { %v342_v2 = vsub.f32 %v333_v60, %v341_v1  ;;  %v343_v3 = vsub.f32 %v335_v62, %v341_v1 }
 0x1f7   : > { %v344_v4 = vmul.f32 %v342_v2, %v342_v2  ;;  %v345_v5 = vmul.f32 %v343_v3, %v343_v3 }
 0x1f9   : > { %v346_v6 = vadd.f32 %v345_v5, %v344_v4 }
 0x1fb   : > { %347 = vadd.xlane.f32.xlu0 %v346_v6 }
 0x288   : > { %v348_v7 = vpop.xlane.xlu0 %347 }
 0x289   : > { %v349_v8 = vmul.f32 0.00390625, %v348_v7 }
 0x28b   : > { %v350_v9 = vadd.f32 1e-12, %v349_v8 }
 0x28d   : > { %620 = vrsqrt.f32 %v350_v9 }
 0x297   : > { %v621_v20 = vpop.eup %620 }
 0x298   : > { %v352_v21 = vmul.f32 %v621_v20, %v342_v2  ;;  %v353_v22 = vmul.f32 %v621_v20, %v343_v3 }
 0x29a   : > { %v372_v25 = vmul.f32 %v367_v18, %v352_v21  ;;  %v373_v26 = vmul.f32 %v371_v19, %v353_v22 }
 0x29c   : > { %v392_v27 = vadd.f32 %v387_v23, %v372_v25  ;;  %v393_v28 = vadd.f32 %v391_v24, %v373_v26 }
 0x29e   : > { %394 = vst [vmem:[%s212_s17] sm:$0xff] %v392_v27  ;;  %395 = vst [vmem:[%s212_s17 + $0x8] sm:$0xff] %v393_v28 }
 0x29f   : > { %721 = shalt.err (!%p718_p2)
}
 0x2a0   : > { %s722_s9 = scalar_lea.hbm %s996_s29, 256  ;;  %s726_s11 = scalar_lea.hbm %s1043_s3, 512 }
 0x2a1   : > { %p723_p13 = scmp.ne.s32.totalorder %s996_s29, %s722_s9  ;;  %p727_p4 = scmp.lt.u32.totalorder %s996_s29, %s1043_s3 }
 0x2a2   : > { %p728_p5 = scmp.lt.u32.totalorder %s726_s11, %s722_s9  ;;  %p730_p11 = scmp.lt.u32.totalorder %s722_s9, %s996_s29 }
 0x2a3   : > { %p724_p6 = pnand %p723_p13, %p1057_p0 }
 0x2a4   : > { %p729_p8 = por %p728_p5, %p727_p4 }
 0x2a5   : > { %p725_p10 = pneg %p724_p6 }
 0x2a6   : > { %p731_p1 = por %p730_p11, %p729_p8 }
 0x2a8   : > { %p732_p3 = pnand %p731_p1, %p725_p10 }
 0x2aa   : > { %735 = shalt.err (!%p732_p3)
}
 0x2ab   : > { %560 = dma.vmem_to_hbm [thread:$0]  (%p1057_p0), %s998_s24, 256, %s996_s29, %s397_s30  }
 0x2ac PF: > { %s423_s22 = sand.u32 1, %s766_s12   ;;  %p1058_p7 = scmp.ne.s32.totalorder %s1048_s19, 0 }
 0x2ad   : > { %p1059_p9 = scmp.ge.s32.totalorder %s778_s15, 2  ;;  %s424_s18 = scalar_lea.sflag [#allocation4], %s423_s22 }
 0x2af   : > { %p574_p12 = pnand %p1059_p9, %p1058_p7 }
 0x2b1   : > { %761 = dma.done.wait (!%p574_p12), %s424_s18, 256  }
 0x2b2   : > { %763 = vsyncadd (!%p574_p12), %s424_s18, 4294967040  ;;  %p17_p2 = scmp.ge.s32.totalorder %s917_s4, 4   ;;  %s1060_s12 = smov %s770_s13 }
 0x2b3   : > { %s1061_s13 = smov %s774_s14  ;;  %s1062_s14 = smov %s933_s7 }
 0x2b4   : > { %s1063_s15 = smov %s917_s4  ;;  %19 = sbr.rel (!%p17_p2) target bundleno = 6 (0x6), region = 85 }
 0x2bb   :  { %429 = vsyncpa [#allocation3], 1 }
 0x2bc   :  { %431 = vsyncpa [#allocation3 + $0x1], 1 }
 0x2bd   :  { %432 = vsyncpa [#allocation6], 1 }
 0x2be   :  { %433 = vsyncpa [#allocation4], 1 }
 0x2bf   :  { %435 = vsyncpa [#allocation4 + $0x1], 1 }

</bundles_post_ra>
